<compile_context>
chip_gen: v7x
topology: tpu7x:2x2x1
jax: 0.10.0
libtpu: 0.0.40
codegen_flags: <defaults>
</compile_context>

<pallas_src>
import functools

import jax
import jax.numpy as jnp
import numpy as np
from jax.experimental import pallas as pl
from jax.experimental.pallas import tpu as pltpu


# ----------------------------- layout helper --------------------------------

def _choose_layout(flat):
    """Pick (rows, lanes) for the per-batch flat axis: lanes a multiple of 128
    (capped at 2048) and rows a multiple of 8, so each block is sublane- and
    lane-dense.  Falls back to a single row if no nice factorization exists
    (block then spans the full dims, which is always legal)."""
    for lanes in (2048, 1024, 512, 256, 128):
        if flat % lanes == 0:
            rows = flat // lanes
            if rows % 8 == 0:
                return rows, lanes
    return 1, flat


# ----------------------------- Pallas kernels -------------------------------

def _forward_diffusion_kernel(sc_ref, x0_ref, eps_ref, out_ref):
    # sc_ref: SMEM f32[2*B] = [sqrt_alpha_cum[t_b]... , sqrt(1-alpha_cum[t_b])...]
    b = pl.program_id(0)
    nb = pl.num_programs(0)
    mean_s = sc_ref[b]
    std_s = sc_ref[nb + b]
    x0 = x0_ref[...].astype(jnp.float32)
    eps = eps_ref[...].astype(jnp.float32)
    out_ref[...] = (eps * std_s + mean_s * x0).astype(out_ref.dtype)


def _reverse_step_kernel(n_steps, tab_ref, t_ref, x_ref, noise_ref, z_ref, out_ref):
    # tab_ref: SMEM f32[3*T] laid out as [a_0..a_{T-1}, b_0.., c_0..] with
    #   a_t = 1/sqrt(alpha_t)
    #   b_t = -(1/sqrt(alpha_t)) * beta_t / sqrt(1 - alpha_cum_t)
    #   c_t = sqrt(beta_t)
    t = t_ref[0]
    a = tab_ref[t]
    b = tab_ref[n_steps + t]
    c = tab_ref[2 * n_steps + t]
    x = x_ref[...].astype(jnp.float32)
    n = noise_ref[...].astype(jnp.float32)
    z = z_ref[...].astype(jnp.float32)
    out_ref[...] = (a * x + b * n + c * z).astype(out_ref.dtype)


def _inverse_transform_values(x_f32):
    # [-1, 1] -> [0, 255]
    return (jnp.clip(x_f32, -1.0, 1.0) + 1.0) * (0.5 * 255.0)


def _store_maybe_uint8(out_ref, v_f32):
    if jnp.issubdtype(out_ref.dtype, jnp.integer):
        # f32 -> s32 truncates toward zero (matches torch .type(torch.uint8)),
        # then a cheap integer narrow to the 8-bit store dtype.
        out_ref[...] = v_f32.astype(jnp.int32).astype(out_ref.dtype)
    else:
        out_ref[...] = v_f32.astype(out_ref.dtype)


def _inverse_transform_kernel(x_ref, out_ref):
    _store_maybe_uint8(out_ref, _inverse_transform_values(x_ref[...].astype(jnp.float32)))


def _reverse_step_inverse_kernel(n_steps, tab_ref, t_ref, x_ref, noise_ref, z_ref,
                                 img_ref):
    # Fused final-step path: one HBM round trip for reverse update + [0,255] map.
    t = t_ref[0]
    a = tab_ref[t]
    b = tab_ref[n_steps + t]
    c = tab_ref[2 * n_steps + t]
    x_new = (a * x_ref[...].astype(jnp.float32)
             + b * noise_ref[...].astype(jnp.float32)
             + c * z_ref[...].astype(jnp.float32))
    _store_maybe_uint8(img_ref, _inverse_transform_values(x_new))


# ----------------------------- wrappers --------------------------------------

_PARALLEL = pltpu.CompilerParams(dimension_semantics=("parallel",))


def forward_diffusion_pallas(x0, eps, mean_scale, std_scale):
    """x0, eps: (B, C, H, W); mean_scale, std_scale: (B,) f32."""
    batch = x0.shape[0]
    flat = int(np.prod(x0.shape[1:]))
    rows, lanes = _choose_layout(flat)
    x3 = x0.reshape(batch, rows, lanes)
    e3 = eps.reshape(batch, rows, lanes)
    scales = jnp.concatenate(
        [mean_scale.reshape(-1), std_scale.reshape(-1)]).astype(jnp.float32)

    img_spec = pl.BlockSpec((1, rows, lanes), lambda b: (b, 0, 0))
    smem = pl.BlockSpec(memory_space=pltpu.MemorySpace.SMEM)
    out = pl.pallas_call(
        _forward_diffusion_kernel,
        out_shape=jax.ShapeDtypeStruct((batch, rows, lanes), x0.dtype),
        grid=(batch,),
        in_specs=[smem, img_spec, img_spec],
        out_specs=img_spec,
        compiler_params=_PARALLEL,
    )(scales, x3, e3)
    return out.reshape(x0.shape)


def reverse_step_pallas(x, predicted_noise, z, coef_table, time_step):
    """One reverse-diffusion update: out = a*x + b*noise + c*z (coeffs from table)."""
    batch = x.shape[0]
    flat = int(np.prod(x.shape[1:]))
    rows, lanes = _choose_layout(flat)
    x3 = x.reshape(batch, rows, lanes)
    n3 = predicted_noise.reshape(batch, rows, lanes)
    z3 = z.reshape(batch, rows, lanes)
    n_steps = coef_table.shape[0] // 3
    t_arr = jnp.asarray(time_step, dtype=jnp.int32).reshape(1)

    img_spec = pl.BlockSpec((1, rows, lanes), lambda b: (b, 0, 0))
    smem = pl.BlockSpec(memory_space=pltpu.MemorySpace.SMEM)
    out = pl.pallas_call(
        functools.partial(_reverse_step_kernel, n_steps),
        out_shape=jax.ShapeDtypeStruct((batch, rows, lanes), x.dtype),
        grid=(batch,),
        in_specs=[smem, smem, img_spec, img_spec, img_spec],
        out_specs=img_spec,
        input_output_aliases={2: 0},   # reuse x's HBM buffer for the output
        compiler_params=_PARALLEL,
    )(coef_table, t_arr, x3, n3, z3)
    return out.reshape(x.shape)


def reverse_step_inverse_pallas(x, predicted_noise, z, coef_table, time_step,
                                out_dtype=jnp.uint8):
    """Fused final sampling step: reverse update + [-1,1]->[0,255] (uint8 out)."""
    batch = x.shape[0]
    flat = int(np.prod(x.shape[1:]))
    rows, lanes = _choose_layout(flat)
    x3 = x.reshape(batch, rows, lanes)
    n3 = predicted_noise.reshape(batch, rows, lanes)
    z3 = z.reshape(batch, rows, lanes)
    n_steps = coef_table.shape[0] // 3
    t_arr = jnp.asarray(time_step, dtype=jnp.int32).reshape(1)

    img_spec = pl.BlockSpec((1, rows, lanes), lambda b: (b, 0, 0))
    smem = pl.BlockSpec(memory_space=pltpu.MemorySpace.SMEM)
    out = pl.pallas_call(
        functools.partial(_reverse_step_inverse_kernel, n_steps),
        out_shape=jax.ShapeDtypeStruct((batch, rows, lanes), out_dtype),
        grid=(batch,),
        in_specs=[smem, smem, img_spec, img_spec, img_spec],
        out_specs=img_spec,
        compiler_params=_PARALLEL,
    )(coef_table, t_arr, x3, n3, z3)
    return out.reshape(x.shape)


def inverse_transform_pallas(x, out_dtype=None):
    """[-1,1] -> [0,255].  out_dtype=None keeps x.dtype (module semantics);
    out_dtype=jnp.uint8 writes the truncated image bytes directly in-kernel."""
    out_dtype = x.dtype if out_dtype is None else out_dtype
    batch = x.shape[0]
    flat = int(np.prod(x.shape[1:]))
    rows, lanes = _choose_layout(flat)
    x3 = x.reshape(batch, rows, lanes)

    img_spec = pl.BlockSpec((1, rows, lanes), lambda b: (b, 0, 0))
    out = pl.pallas_call(
        _inverse_transform_kernel,
        out_shape=jax.ShapeDtypeStruct((batch, rows, lanes), out_dtype),
        grid=(batch,),
        in_specs=[img_spec],
        out_specs=img_spec,
        compiler_params=_PARALLEL,
    )(x3)
    return out.reshape(x.shape)


# ----------------------------- LDM module ------------------------------------

class LDM:
    """JAX/Pallas port of the LDM wrapper (schedule + diffusion math)."""

    def __init__(self, image_size: int, image_channels: int = 32,
                 n_diffusion_steps: int = 1000, inverse_scale_transform: bool = True):
        self.image_dim = (image_channels, image_size // 8, image_size // 8)
        self.n_diffusion_steps = n_diffusion_steps
        self.inverse_scale_transform = inverse_scale_transform

        self.betas = self.__get_betas()
        self.alphas = 1.0 - self.betas
        self.sqrt_beta = jnp.sqrt(self.betas)
        self.alpha_cumulative = jnp.cumprod(self.alphas, axis=0)
        self.sqrt_alpha_cumulative = jnp.sqrt(self.alpha_cumulative)
        self.one_by_sqrt_alpha = 1.0 / jnp.sqrt(self.alphas)
        self.sqrt_one_minus_alpha_cumulative = jnp.sqrt(1.0 - self.alpha_cumulative)

        # Precomputed reverse-step coefficient table (hoisted out of the
        # sampling loop), flattened 1D for SMEM: [a_0.., b_0.., c_0..].
        coef_a = self.one_by_sqrt_alpha
        coef_b = -(self.one_by_sqrt_alpha * self.betas
                   / self.sqrt_one_minus_alpha_cumulative)
        coef_c = self.sqrt_beta
        self.reverse_coef_table = jnp.concatenate(
            [coef_a, coef_b, coef_c]).astype(jnp.float32)

    def __get_betas(self, scheduler: str = "linear"):
        if scheduler == "linear":
            scale = 1000.0 / self.n_diffusion_steps
            beta_start = scale * 0.0001
            beta_end = scale * 0.02
            return jnp.linspace(beta_start, beta_end, self.n_diffusion_steps,
                                dtype=jnp.float32)
        raise NotImplementedError("Only the linear beta scheduler is implemented")

    def forward_diffusion(self, x0, timesteps, key):
        """q(x_t | x_0): sample = eps * std_t + mean_t * x0.  Returns (sample, eps)."""
        eps = jax.random.normal(key, x0.shape, dtype=x0.dtype)
        timesteps = jnp.asarray(timesteps, dtype=jnp.int32).reshape(-1)
        mean_scale = self.sqrt_alpha_cumulative[timesteps]            # (B,)
        std_scale = self.sqrt_one_minus_alpha_cumulative[timesteps]   # (B,)
        sample = forward_diffusion_pallas(x0, eps, mean_scale, std_scale)
        return sample, eps

    def forward(self, x0, timesteps):
        # TODO(synk): LDM.forward delegates to an external UNet (and the sampling
        # pipeline to an external AutoencoderVQ); neither is defined in this module.
        raise NotImplementedError("External UNet is not part of this module")

    def reverse_step(self, x, predicted_noise, z, time_step):
        """One step of the reverse (sampling) update from backward_diffusion_sampling."""
        return reverse_step_pallas(x, predicted_noise, z,
                                   self.reverse_coef_table, time_step)

    def reverse_step_and_inverse_transform(self, x, predicted_noise, z, time_step,
                                           out_dtype=jnp.uint8):
        """Fused final-step path (reverse update + [0,255] map + uint8 store)."""
        return reverse_step_inverse_pallas(x, predicted_noise, z,
                                           self.reverse_coef_table, time_step,
                                           out_dtype)

    @staticmethod
    def inverse_transform(tensors, out_dtype=None):
        """Convert tensors from [-1., 1.] to [0., 255.]."""
        return inverse_transform_pallas(tensors, out_dtype=out_dtype)


# ----------------------------- demo / test ------------------------------------

if __name__ == "__main__":
    B, C, H, W = 2, 4, 16, 16
    key = jax.random.PRNGKey(0)
    k_x0, k_eps, k_noise, k_z = jax.random.split(key, 4)

    ldm = LDM(image_size=H * 8, image_channels=C, n_diffusion_steps=1000)

    x0 = jax.random.normal(k_x0, (B, C, H, W), dtype=jnp.float32)
    timesteps = jnp.array([17, 512], dtype=jnp.int32)

    # ---- forward diffusion (q-sample) via Pallas -----------------------------
    sample, eps = ldm.forward_diffusion(x0, timesteps, k_eps)
    sample = jax.block_until_ready(sample)
    mean_ref = ldm.sqrt_alpha_cumulative[timesteps].reshape(-1, 1, 1, 1) * x0
    std_ref = ldm.sqrt_one_minus_alpha_cumulative[timesteps].reshape(-1, 1, 1, 1)
    sample_ref = eps * std_ref + mean_ref
    np.testing.assert_allclose(np.asarray(sample), np.asarray(sample_ref),
                               rtol=1e-5, atol=1e-5)

    # ---- one reverse-diffusion update step via Pallas ------------------------
    predicted_noise = jax.random.normal(k_noise, (B, C, H, W), dtype=jnp.float32)
    z = jax.random.normal(k_z, (B, C, H, W), dtype=jnp.float32)
    t = 500
    # reference computed before the aliased kernel call
    x_next_ref = np.asarray(
        ldm.one_by_sqrt_alpha[t]
        * (sample - ldm.betas[t] / ldm.sqrt_one_minus_alpha_cumulative[t]
           * predicted_noise)
        + jnp.sqrt(ldm.betas[t]) * z)
    x_next = jax.block_until_ready(ldm.reverse_step(sample, predicted_noise, z, t))
    np.testing.assert_allclose(np.asarray(x_next), x_next_ref, rtol=1e-5, atol=1e-5)

    # ---- inverse transform: float path (module semantics) --------------------
    img_f = jax.block_until_ready(LDM.inverse_transform(x_next))
    img_f_ref = (jnp.clip(x_next, -1.0, 1.0) + 1.0) / 2.0 * 255.0
    np.testing.assert_allclose(np.asarray(img_f), np.asarray(img_f_ref),
                               rtol=1e-5, atol=1e-3)

    # ---- inverse transform: uint8 path (in-kernel truncating cast) -----------
    img_u8 = jax.block_until_ready(LDM.inverse_transform(x_next, out_dtype=jnp.uint8))
    img_u8_ref = np.asarray((jnp.clip(x_next, -1.0, 1.0) + 1.0) * 127.5).astype(np.uint8)
    diff = np.abs(np.asarray(img_u8, dtype=np.int32) - img_u8_ref.astype(np.int32))
    assert diff.max() <= 1   # +/-1 tolerance for float rounding at integer edges

    # ---- fused final step: reverse_step + inverse_transform ------------------
    t_last = 1
    z_zero = jnp.zeros_like(x_next)          # final step uses z = 0
    x_last_ref = (ldm.one_by_sqrt_alpha[t_last]
                  * (x_next - ldm.betas[t_last]
                     / ldm.sqrt_one_minus_alpha_cumulative[t_last] * predicted_noise)
                  + jnp.sqrt(ldm.betas[t_last]) * z_zero)
    img_fused_ref = np.asarray(
        (jnp.clip(x_last_ref, -1.0, 1.0) + 1.0) * 127.5).astype(np.uint8)
    img_fused = jax.block_until_ready(
        ldm.reverse_step_and_inverse_transform(x_next, predicted_noise, z_zero, t_last))
    diff = np.abs(np.asarray(img_fused, dtype=np.int32) - img_fused_ref.astype(np.int32))
    assert diff.max() <= 1

    assert sample.shape == (B, C, H, W)
    assert img_u8.shape == (B, C, H, W) and img_u8.dtype == jnp.uint8
    assert img_fused.shape == (B, C, H, W) and img_fused.dtype == jnp.uint8
    print("KERNEL_OK")
</pallas_src>

<mosaic_0001>
module attributes {stable_mosaic.version = 11 : i64} {
  func.func @_forward_diffusion_kernel(%arg0: i32, %arg1: memref<4xf32, #tpu.memory_space<smem>>, %arg2: memref<1x8x128xf32, #tpu.memory_space<vmem>>, %arg3: memref<1x8x128xf32, #tpu.memory_space<vmem>>, %arg4: memref<1x8x128xf32, #tpu.memory_space<vmem>>) attributes {dimension_semantics = [#tpu.dimension_semantics<parallel>], iteration_bounds = array<i64: 2>, scalar_prefetch = 0 : i64, scratch_operands = 0 : i64, tpu.core_type = #tpu.core_type<tc>, window_params = [{transform_indices = @transform_0, window_bounds = array<i64: 4>}, {transform_indices = @transform_1, window_bounds = array<i64: 1, 8, 128>}, {transform_indices = @transform_2, window_bounds = array<i64: 1, 8, 128>}, {transform_indices = @transform_3, window_bounds = array<i64: 1, 8, 128>}]} {
    %0 = arith.index_cast %arg0 : i32 to index
    %1 = memref.load %arg1[%0] : memref<4xf32, #tpu.memory_space<smem>>
    %c2_i32 = arith.constant 2 : i32
    %2 = arith.addi %c2_i32, %arg0 : i32
    %3 = arith.index_cast %2 : i32 to index
    %4 = memref.load %arg1[%3] : memref<4xf32, #tpu.memory_space<smem>>
    %c0 = arith.constant 0 : index
    %c0_0 = arith.constant 0 : index
    %c0_1 = arith.constant 0 : index
    %5 = vector.load %arg2[%c0, %c0_0, %c0_1] : memref<1x8x128xf32, #tpu.memory_space<vmem>>, vector<1x8x128xf32>
    %c0_2 = arith.constant 0 : index
    %c0_3 = arith.constant 0 : index
    %c0_4 = arith.constant 0 : index
    %6 = vector.load %arg3[%c0_2, %c0_3, %c0_4] : memref<1x8x128xf32, #tpu.memory_space<vmem>>, vector<1x8x128xf32>
    %7 = vector.broadcast %4 : f32 to vector<1x8x128xf32>
    %8 = arith.mulf %6, %7 : vector<1x8x128xf32>
    %9 = vector.broadcast %1 : f32 to vector<1x8x128xf32>
    %10 = arith.mulf %9, %5 : vector<1x8x128xf32>
    %11 = arith.addf %8, %10 : vector<1x8x128xf32>
    %c0_5 = arith.constant 0 : index
    %c0_6 = arith.constant 0 : index
    %c0_7 = arith.constant 0 : index
    %12 = vector.load %arg4[%c0_5, %c0_6, %c0_7] : memref<1x8x128xf32, #tpu.memory_space<vmem>>, vector<1x8x128xf32>
    tpu.vector_store %arg4[%c0_5, %c0_6, %c0_7], %11 {strides = array<i32>} : memref<1x8x128xf32, #tpu.memory_space<vmem>>, vector<1x8x128xf32>,
    return
  }
  func.func @transform_0(%arg0: i32) -> i32 {
    %c0_i32 = arith.constant 0 : i32
    %c0_i32_0 = arith.constant 0 : i32
    return %c0_i32 : i32
  }
  func.func @transform_1(%arg0: i32) -> (i32, i32, i32) {
    %c0_i32 = arith.constant 0 : i32
    %c0_i32_0 = arith.constant 0 : i32
    %c0_i32_1 = arith.constant 0 : i32
    return %arg0, %c0_i32, %c0_i32_0 : i32, i32, i32
  }
  func.func @transform_2(%arg0: i32) -> (i32, i32, i32) {
    %c0_i32 = arith.constant 0 : i32
    %c0_i32_0 = arith.constant 0 : i32
    %c0_i32_1 = arith.constant 0 : i32
    return %arg0, %c0_i32, %c0_i32_0 : i32, i32, i32
  }
  func.func @transform_3(%arg0: i32) -> (i32, i32, i32) {
    %c0_i32 = arith.constant 0 : i32
    %c0_i32_0 = arith.constant 0 : i32
    %c0_i32_1 = arith.constant 0 : i32
    return %arg0, %c0_i32, %c0_i32_0 : i32, i32, i32
  }
}

</mosaic_0001>

<bundles_post_ra>
// kernel: tpu_custom_call.1
= control target key start
LH: loop header
LB: loop body
LE: loop exit
PB: predicated region body
PF: predicated region fallthrough
CT: control target
= control target key end

     0   :  { %8 = vsyncpa [#allocation5], 0  ;;  %s854_s0 = inlined_call_operand.hbm [shape: f32[4], index: 0, kind: input, shape index: {}]   ;;  %s855_s1 = inlined_call_operand.hbm [shape: f32[2,8,128], index: 1, kind: input, shape index: {}]   ;;  %s856_s2 = inlined_call_operand.hbm [shape: f32[2,8,128], index: 2, kind: input, shape index: {}]   ;;  %s857_s3 = inlined_call_operand.hbm [shape: f32[2,8,128], index: 3, kind: output, shape index: {}]  }
   0x1   :  { %9 = vsyncpa [#allocation3], 0 }
   0x2   :  { %11 = vsyncpa [#allocation3 + $0x1], 0 }
   0x3   :  { %12 = vsyncpa [#allocation8], 0 }
   0x4   :  { %14 = vsyncpa [#allocation8 + $0x1], 0 }
   0x5   :  { %15 = vsyncpa [#allocation4], 0 }
   0x6   :  { %17 = vsyncpa [#allocation4 + $0x1], 0  ;;  %s617_s12 = smov 0   ;;  %s619_s13 = smov 0  }
   0x7   :  { %s621_s14 = smov 0   ;;  %s623_s15 = smov 0  }
   0x8 LB: > { %s638_s16 = sadd.s32 4294967295, %s591_s15   ;;  %s365_s17 = sadd.s32 4294967294, %s591_s15   ;;  %s591_s15 = sphi %s623_s15, %s879_s15   ;;  %s587_s14 = sphi %s621_s14, %s878_s14   ;;  %s583_s13 = sphi %s619_s13, %s877_s13   ;;  %s579_s12 = sphi %s617_s12, %s876_s12  }
   0x9   : > { %s642_s18 = sadd.s32 1, %s591_s15   ;;  %s51_s19 = sadd.s32 1, %s587_s14 }
   0xa   : > { %s48_s20 = ssub.s32 %s591_s15, %s642_s18  ;;  %p58_p0 = scmp.ne.s32.totalorder %s587_s14, %s583_s13 }
   0xb   : > { %p49_p1 = scmp.eq.s32.totalorder %s48_s20, 0  ;;  %p64_p2 = scmp.ne.s32.totalorder %s583_s13, %s579_s12 }
   0xc   : > { %p858_p3 = scmp.eq.s32.totalorder %s638_s16, 0  ;;  %p114_p4 = scmp.eq.s32.totalorder %s638_s16, 1 }
   0xd   : > { %s654_s21 = scalar_select %p49_p1, %s587_s14, %s51_s19  }
   0xe   : > { %p658_p5 = por %p858_p3, %p64_p2  ;;  %p665_p6 = por %p114_p4, %p58_p0 }
   0xf   : > { %p120_p7 = scmp.eq.s32.totalorder %s365_s17, 1  ;;  %p366_p8 = scmp.ge.s32.totalorder %s591_s15, 1 }
  0x10   : > { %s862_s22 = scalar_select %p658_p5, 1, 0 }
  0x11   : > { %s863_s23 = scalar_select %p665_p6, 1, 0 }
  0x12   : > { %p127_p9 = scmp.lt.s32.totalorder %s591_s15, 3  ;;  %p671_p10 = por %p120_p7, %p64_p2 }
  0x13   : > { %p59_p13 = scmp.eq.s32.totalorder %s591_s15, 0  ;;  %p408_p1 = scmp.lt.s32.totalorder %s591_s15, 2 }
  0x14   : > { %s864_s24 = scalar_select %p671_p10, 1, 0 }
  0x15   : > { %p675_p11 = pnand %p366_p8, %p127_p9  ;;  %s685_s26 = sand.u32 1, %s587_s14  }
  0x16   : > { %p690_p3 = por %p59_p13, %p58_p0  ;;  %p867_p2 = scmp.eq.s32.totalorder %s638_s16, 0 }
  0x17   : > { %s865_s25 = scalar_select %p675_p11, 1, 0 }
  0x18   : > { %p392_p4 = pneg %p675_p11  ;;  %s369_s28 = sshll.u32 %s685_s26, 3 }
  0x19   : > { %s370_s29 = sshll.u32 %s591_s15, 7  ;;  %s444_s8 = scalar_lea.hbm %s854_s0, 16 }
  0x1a   : > { %p393_p7 = pnand %p392_p4, %p867_p2  ;;  %s703_s5 = scalar_lea.hbm %s855_s1, %s370_s29 }
  0x1b   : > { %p445_p0 = scmp.ne.s32.totalorder %s854_s0, %s444_s8  ;;  %p451_p4 = scmp.lt.u32.totalorder %s444_s8, %s854_s0 }
  0x1c   : > { %p446_p8 = pneg %p393_p7 }
  0x1e   : > { %p447_p9 = pnand %p446_p8, %p445_p0 }
  0x20   : > { %p448_p13 = pneg %p447_p9 }
  0x22   : > { %p453_p2 = pnand %p451_p4, %p448_p13 }
  0x24   : > { %456 = shalt.err (!%p453_p2)
}
  0x25   : > { %s593_s19 = smov [#allocation2]   ;;  %s153_s4 = scalar_lea.vmem [#allocation6], %s369_s28 }
  0x26   : > { %395 = dma.hbm_to_smem (!%p393_p7), %s854_s0, 16, %s593_s19, [#allocation5]  }
  0x27   : > { %s160_s6 = sshll.u32 %s153_s4, 4  ;;  %p723_p0 = pnand %p408_p1, %p690_p3  ;;  %s727_s6 = int_to_ptr.vmem [resolvable:$true] %s160_s6 }
  0x28   : > { %s150_s8 = scalar_lea.sflag [#allocation3], %s685_s26  ;;  %s457_s9 = scalar_lea.hbm %s703_s5, 128 }
  0x29   : > { %p458_p8 = scmp.ne.s32.totalorder %s703_s5, %s457_s9  ;;  %p459_p9 = pneg %p723_p0 }
  0x2a   : > { %s462_s11 = scalar_lea.hbm %s855_s1, 256  ;;  %p463_p3 = scmp.lt.u32.totalorder %s703_s5, %s855_s1 }
  0x2b   : > { %p460_p7 = pnand %p459_p9, %p458_p8  ;;  %p464_p1 = scmp.lt.u32.totalorder %s462_s11, %s457_s9 }
  0x2c   : > { %p466_p2 = scmp.lt.u32.totalorder %s457_s9, %s703_s5 }
  0x2d   : > { %p461_p13 = pneg %p460_p7  ;;  %p465_p4 = por %p464_p1, %p463_p3 }
  0x2f   : > { %p467_p12 = por %p466_p2, %p465_p4 }
  0x31   : > { %p468_p10 = pnand %p467_p12, %p461_p13 }
  0x33   : > { %471 = shalt.err (!%p468_p10)
}
  0x34   : > { %s472_s20 = scalar_lea.vmem %s727_s6, 128  ;;  %s594_s30 = smov [#allocation6]  }
  0x35   : > { %p473_p8 = scmp.ne.s32.totalorder %s727_s6, %s472_s20  ;;  %s477_s4 = sshll.u32 %s594_s30, 4  ;;  %s478_s4 = int_to_ptr.vmem [resolvable:$false] %s477_s4 }
  0x36   : > { %s479_s10 = scalar_lea.vmem %s478_s4, 256  ;;  %p480_p5 = scmp.lt.s32.totalorder %s727_s6, %s478_s4 }
  0x37   : > { %p475_p7 = pnand %p473_p8, %p459_p9  ;;  %p481_p3 = scmp.lt.s32.totalorder %s479_s10, %s472_s20 }
  0x39   : > { %p476_p6 = pneg %p475_p7  ;;  %p482_p1 = por %p481_p3, %p480_p5 }
  0x3b   : > { %p483_p4 = pnand %p482_p1, %p476_p6 }
  0x3d   : > { %486 = shalt.err (!%p483_p4)
}
  0x3e   : > { %399 = dma.hbm_to_vmem [thread:$0]  (!%p723_p0), %s703_s5, 128, %s727_s6, %s150_s8  }
  0x3f   : > { %s760_s11 = scalar_lea.hbm %s856_s2, %s370_s29  ;;  %s171_s17 = scalar_lea.vmem [#allocation7], %s369_s28 }
  0x40   : > { %s178_s19 = sshll.u32 %s171_s17, 4  ;;  %s168_s20 = scalar_lea.sflag [#allocation8], %s685_s26  ;;  %s179_s19 = int_to_ptr.vmem [resolvable:$true] %s178_s19 }
  0x41   : > { %s487_s30 = scalar_lea.hbm %s760_s11, 128  ;;  %s492_s29 = scalar_lea.hbm %s856_s2, 256 }
  0x42   : > { %p488_p5 = scmp.ne.s32.totalorder %s760_s11, %s487_s30  ;;  %p493_p12 = scmp.lt.u32.totalorder %s760_s11, %s856_s2 }
  0x43   : > { %p494_p13 = scmp.lt.u32.totalorder %s492_s29, %s487_s30  ;;  %p496_p8 = scmp.lt.u32.totalorder %s487_s30, %s760_s11 }
  0x44   : > { %p490_p6 = pnand %p488_p5, %p459_p9 }
  0x45   : > { %p495_p2 = por %p494_p13, %p493_p12 }
  0x46   : > { %p491_p10 = pneg %p490_p6 }
  0x47   : > { %p497_p7 = por %p496_p8, %p495_p2 }
  0x49   : > { %p498_p3 = pnand %p497_p7, %p491_p10 }
  0x4b   : > { %501 = shalt.err (!%p498_p3)
}
  0x4c   : > { %s502_s26 = scalar_lea.vmem %s179_s19, 128  ;;  %s595_s28 = smov [#allocation7]  }
  0x4d   : > { %p503_p1 = scmp.ne.s32.totalorder %s179_s19, %s502_s26  ;;  %s507_s10 = sshll.u32 %s595_s28, 4  ;;  %s508_s10 = int_to_ptr.vmem [resolvable:$false] %s507_s10 }
  0x4e   : > { %s509_s9 = scalar_lea.vmem %s508_s10, 256  ;;  %p510_p6 = scmp.lt.s32.totalorder %s179_s19, %s508_s10 }
  0x4f   : > { %p505_p4 = pnand %p503_p1, %p459_p9  ;;  %p511_p11 = scmp.lt.s32.totalorder %s509_s9, %s502_s26 }
  0x51   : > { %p506_p5 = pneg %p505_p4  ;;  %p512_p12 = por %p511_p11, %p510_p6 }
  0x53   : > { %p513_p13 = pnand %p512_p12, %p506_p5 }
  0x55   : > { %516 = shalt.err (!%p513_p13)
}
  0x56   : > { %402 = dma.hbm_to_vmem [thread:$0]  (!%p723_p0), %s760_s11, 128, %s179_s19, %s168_s20  }
  0x57   : > { %p869_p10 = scmp.ne.s32.totalorder %s865_s25, 0 }
  0x58   : > { %p870_p2 = scmp.eq.s32.totalorder (!%p869_p10), %s638_s16, 0 }
  0x59   : > { %187 = sbr.rel (%p869_p10) target bundleno = 132 (0x84), region = 32 }
  0x60   : > { %562 = dma.done.wait (%p870_p2), [#allocation5], 16   ;;  %p871_p9 = pmov %p870_p2 }
  0x61   : > { %s791_s27 = sand.u32 1, %s583_s13   ;;  %p872_p11 = scmp.ne.s32.totalorder %s862_s22, 0 }
  0x62   : > { %564 = vsyncadd (%p871_p9), [#allocation5], 4294967280  ;;  %s375_s17 = sshll.u32 %s791_s27, 3  ;;  %s194_s30 = scalar_lea.sflag [#allocation3], %s791_s27 }
  0x63   : > { %s197_s7 = scalar_lea.vmem [#allocation6], %s375_s17 }
  0x64   : > { %566 = dma.done.wait (%p872_p11), %s194_s30, 128  }
  0x65   : > { %568 = vsyncadd (%p872_p11), %s194_s30, 4294967168  ;;  %s203_s25 = scalar_lea.sflag [#allocation8], %s791_s27  ;;  %s206_s11 = scalar_lea.vmem [#allocation7], %s375_s17 }
  0x66   : > { %570 = dma.done.wait (%p872_p11), %s203_s25, 128  }
  0x67   : > { %572 = vsyncadd (%p872_p11), %s203_s25, 4294967168 }
  0x68   : > { %211 = sfence }
  0x69   : > { %s235_s19 = sld [smem:[#allocation2 + %s638_s16]]  ;;  %s236_s20 = sadd.s32 2, %s638_s16  ;;  %v238_v0 = vld [vmem:[%s197_s7] sm:$0xff]  ;;  %v239_v1 = vld [vmem:[%s206_s11] sm:$0xff] }
  0x6a   : > { %s237_s5 = sld [smem:[#allocation2 + %s236_s20]]  ;;  %s234_s6 = scalar_lea.vmem [#allocation9], %s375_s17 }
  0x6b   : > { %s260_s29 = sshll.u32 %s234_s6, 4  ;;  %s379_s8 = sshll.u32 %s638_s16, 7  ;;  %s807_s29 = int_to_ptr.vmem [resolvable:$true] %s260_s29 }
  0x6c   : > { %s812_s26 = scalar_lea.hbm %s857_s3, %s379_s8  ;;  %s247_s28 = scalar_lea.sflag [#allocation4], %s791_s27 }
  0x6d   : > { %s517_s10 = scalar_lea.vmem %s807_s29, 128  ;;  %p873_p8 = scmp.ne.s32.totalorder %s863_s23, 0 }
  0x6e   : > { %p518_p0 = scmp.ne.s32.totalorder %s807_s29, %s517_s10  ;;  %s596_s16 = smov [#allocation9]  }
  0x6f   : > { %v242_v2 = vstv %s235_s19  ;;  %s521_s9 = sshll.u32 %s596_s16, 4  ;;  %s522_s9 = int_to_ptr.vmem [resolvable:$false] %s521_s9 }
  0x70   : > { %v243_v3 = vmul.f32 %v242_v2, %v238_v0  ;;  %v240_v4 = vstv %s237_s5  ;;  %p519_p7 = pnand %p518_p0, %p873_p8  ;;  %s523_s17 = scalar_lea.vmem %s522_s9, 256 }
  0x71   : > { %v241_v5 = vmul.f32 %v240_v4, %v239_v1  ;;  %p524_p1 = scmp.lt.s32.totalorder %s807_s29, %s522_s9  ;;  %p525_p4 = scmp.lt.s32.totalorder %s523_s17, %s517_s10 }
  0x72   : > { %p520_p3 = pneg %p519_p7 }
  0x73   : > { %v244_v6 = vadd.f32 %v243_v3, %v241_v5  ;;  %p526_p5 = por %p525_p4, %p524_p1 }
  0x75   : > { %245 = vst [vmem:[%s234_s6] sm:$0xff] %v244_v6  ;;  %p527_p6 = pnand %p526_p5, %p520_p3 }
  0x77   : > { %530 = shalt.err (!%p527_p6)
}
  0x78   : > { %s531_s27 = scalar_lea.hbm %s812_s26, 128  ;;  %s535_s25 = scalar_lea.hbm %s857_s3, 256 }
  0x79   : > { %p532_p12 = scmp.ne.s32.totalorder %s812_s26, %s531_s27  ;;  %p536_p2 = scmp.lt.u32.totalorder %s812_s26, %s857_s3 }
  0x7a   : > { %p537_p9 = scmp.lt.u32.totalorder %s535_s25, %s531_s27  ;;  %p539_p0 = scmp.lt.u32.totalorder %s531_s27, %s812_s26 }
  0x7b   : > { %p533_p13 = pnand %p532_p12, %p873_p8 }
  0x7c   : > { %p538_p11 = por %p537_p9, %p536_p2 }
  0x7d   : > { %p534_p10 = pneg %p533_p13 }
  0x7e   : > { %p540_p7 = por %p539_p0, %p538_p11 }
  0x80   : > { %p541_p3 = pnand %p540_p7, %p534_p10 }
  0x82   : > { %544 = shalt.err (!%p541_p3)
}
  0x83   : > { %390 = dma.vmem_to_hbm [thread:$0]  (%p873_p8), %s807_s29, 128, %s812_s26, %s247_s28  }
  0x84 PF: > { %s272_s20 = sand.u32 1, %s579_s12   ;;  %p874_p1 = scmp.ne.s32.totalorder %s864_s24, 0 }
  0x85   : > { %p875_p4 = scmp.ge.s32.totalorder %s591_s15, 2  ;;  %s273_s5 = scalar_lea.sflag [#allocation4], %s272_s20 }
  0x87   : > { %p404_p5 = pnand %p875_p4, %p874_p1 }
  0x89   : > { %574 = dma.done.wait (!%p404_p5), %s273_s5, 128  }
  0x8a   : > { %576 = vsyncadd (!%p404_p5), %s273_s5, 4294967168  ;;  %p20_p6 = scmp.ge.s32.totalorder %s642_s18, 4   ;;  %s876_s12 = smov %s583_s13 }
  0x8b   : > { %s877_s13 = smov %s587_s14  ;;  %s878_s14 = smov %s654_s21 }
  0x8c   : > { %s879_s15 = smov %s642_s18  ;;  %22 = sbr.rel (!%p20_p6) target bundleno = 8 (0x8), region = 95 }
  0x93   :  { %278 = vsyncpa [#allocation3], 1 }
  0x94   :  { %280 = vsyncpa [#allocation3 + $0x1], 1 }
  0x95   :  { %281 = vsyncpa [#allocation8], 1 }
  0x96   :  { %283 = vsyncpa [#allocation8 + $0x1], 1 }
  0x97   :  { %284 = vsyncpa [#allocation4], 1 }
  0x98   :  { %286 = vsyncpa [#allocation4 + $0x1], 1 }
  0x99   :  { %287 = vsyncpa [#allocation5], 1 }
  0x9a   :  { %289 = vsyncpa [#allocation5 + $0x1], 1 }

</bundles_post_ra>
